<compile_context>
chip_gen: v6e
topology: v6e:2x2x1
jax: 0.10.0
libtpu: 0.0.40
codegen_flags: <defaults>
</compile_context>

<pallas_src>
import numpy as np
import jax
import jax.numpy as jnp
from jax.experimental import pallas as pl
from jax.experimental.pallas import tpu as pltpu

NUM_CLASSES = 100


def _round_up(n, m):
    return ((n + m - 1) // m) * m


def ensemble_kernel(x_ref, a_ref, c_ref, o_ref):
    # Fully-folded ensemble head: one lane-dense bf16 matmul with f32
    # accumulation, then f32 bias add + ReLU on the VPU, one unmasked store.
    y = (jnp.dot(x_ref[...], a_ref[...], preferred_element_type=jnp.float32)
         + c_ref[...])
    o_ref[...] = jnp.maximum(y, 0.0).astype(o_ref.dtype)


def prepare_ensemble_params(gen_W, gen_b, spec_W, spec_b, spec_M, lc_W, lc_b,
                            *, compute_dtype=jnp.bfloat16):
    """One-time offline fold + padding. Call once; keep the results around."""
    D, NC = gen_W.shape
    # Specialist fold (exact for the linear stand-in sub-models):
    #   A = gen_W + sum_s W_s @ M_s ;  c = gen_b + sum_s b_s @ M_s
    A = gen_W + jnp.einsum('sdk,skn->dn', spec_W, spec_M)
    c = gen_b + jnp.einsum('sk,skn->n', spec_b, spec_M)[None, :]
    # linear_classifier fold (exact regardless of sub-model linearity):
    #   A' = A @ lc_W ;  c' = c @ lc_W + lc_b    (all in f32)
    A2 = A @ lc_W
    c2 = c @ lc_W + lc_b
    # Lane-dense padding: D, NC -> multiples of 128.
    Dp = _round_up(D, 128)
    NCp = _round_up(max(NC, 128), 128)
    A_pad = jnp.zeros((Dp, NCp), compute_dtype).at[:D, :NC].set(
        A2.astype(compute_dtype))
    c_pad = jnp.zeros((1, NCp), jnp.float32).at[:, :NC].set(c2)
    return A_pad, c_pad


def ensemble_forward(x, A_pad, c_pad, *, num_classes=NUM_CLASSES, tile_b=256):
    """Hot path: one (B, D) @ (D, 128) matmul + bias + ReLU in one kernel."""
    B = x.shape[0]
    x_flat = x.reshape(B, -1)
    D = x_flat.shape[1]
    Dp, NCp = A_pad.shape

    compute_dtype = A_pad.dtype
    x_flat = x_flat.astype(compute_dtype)
    if D != Dp:  # no-op for D=1024 (already lane aligned)
        x_flat = jnp.zeros((B, Dp), compute_dtype).at[:, :D].set(x_flat)

    # Batch tiling: small B -> one grid step with block_shape == full array
    # dims (no HBM x_pad round trip; Mosaic pads sublanes internally).
    # Large B -> grid over 256-row tiles, "parallel" so v7x's two TensorCores
    # split the batch while the folded weights stay VMEM-resident.
    if B <= tile_b:
        bb, nb, Bp = B, 1, B
        x_in = x_flat
    else:
        bb = tile_b
        Bp = _round_up(B, bb)
        nb = Bp // bb
        x_in = (x_flat if Bp == B
                else jnp.zeros((Bp, Dp), compute_dtype).at[:B].set(x_flat))

    flops = 2 * Bp * Dp * NCp
    bytes_accessed = (
        Bp * Dp * 2        # x (bf16)
        + Dp * NCp * 2     # folded head weights (bf16)
        + NCp * 4          # folded bias (f32)
        + Bp * NCp * 4)    # output (f32)

    out = pl.pallas_call(
        ensemble_kernel,
        out_shape=jax.ShapeDtypeStruct((Bp, NCp), jnp.float32),
        grid_spec=pltpu.PrefetchScalarGridSpec(
            num_scalar_prefetch=0,
            grid=(nb,),
            in_specs=[
                pl.BlockSpec((bb, Dp), lambda i: (i, 0)),    # x tile
                pl.BlockSpec((Dp, NCp), lambda i: (0, 0)),   # folded head W (resident)
                pl.BlockSpec((1, NCp), lambda i: (0, 0)),    # folded head b (resident)
            ],
            out_specs=pl.BlockSpec((bb, NCp), lambda i: (i, 0)),
        ),
        compiler_params=pltpu.CompilerParams(
            dimension_semantics=("parallel",)),
        cost_estimate=pl.CostEstimate(flops=flops, transcendentals=0,
                                      bytes_accessed=bytes_accessed),
    )(x_in, A_pad, c_pad)

    return out[:B, :num_classes]


def reference_forward_f32(x, gen_W, gen_b, spec_W, spec_b, spec_M, lc_W, lc_b):
    """Pure-f32 reference mirroring MyEnsemble.forward (unfolded structure)."""
    B = x.shape[0]
    x_flat = x.reshape(B, -1)
    acc = x_flat @ gen_W + gen_b
    for s in range(spec_W.shape[0]):
        spec = x_flat @ spec_W[s] + spec_b[s][None, :]
        acc = acc + spec @ spec_M[s]
    return jnp.maximum(acc @ lc_W + lc_b, 0.0)


def reference_forward_matched(x, gen_W, gen_b, spec_W, spec_b, spec_M,
                              lc_W, lc_b, compute_dtype=jnp.bfloat16):
    """Precision-matched reference: same f32 fold + bf16 cast + f32 accumulation."""
    B = x.shape[0]
    x_flat = x.reshape(B, -1).astype(compute_dtype)
    A = gen_W + jnp.einsum('sdk,skn->dn', spec_W, spec_M)
    c = gen_b + jnp.einsum('sk,skn->n', spec_b, spec_M)[None, :]
    A2 = (A @ lc_W).astype(compute_dtype)
    c2 = c @ lc_W + lc_b
    y = jnp.dot(x_flat, A2, preferred_element_type=jnp.float32) + c2
    return jnp.maximum(y, 0.0)


if __name__ == "__main__":
    B, C, H, W = 2, 4, 16, 16
    clusters = [[0, 1, 2, 3, 4], [5, 6, 7, 8, 9, 10], [50, 60, 70, 80]]
    S = len(clusters)
    D = C * H * W
    Kp = 8  # padded specialist-logit width (max len(cluster)+1 = 7, pad to 8)

    key = jax.random.PRNGKey(0)
    keys = jax.random.split(key, 6 + S)

    x = jax.random.normal(keys[0], (B, C, H, W), jnp.float32)

    # Generalist head parameters.
    gen_W = 0.02 * jax.random.normal(keys[1], (D, NUM_CLASSES), jnp.float32)
    gen_b = 0.02 * jax.random.normal(keys[2], (1, NUM_CLASSES), jnp.float32)

    # linear_classifier = nn.Linear(100, 100); stored pre-transposed (in, out).
    lc_W = 0.02 * jax.random.normal(keys[3], (NUM_CLASSES, NUM_CLASSES), jnp.float32)
    lc_b = 0.02 * jax.random.normal(keys[4], (1, NUM_CLASSES), jnp.float32)

    # Specialist heads (padded to Kp) + constant remap matrices M_i encoding
    # get_specialist_logits exactly.
    spec_W = np.zeros((S, D, Kp), np.float32)
    spec_b = np.zeros((S, Kp), np.float32)
    spec_M = np.zeros((S, Kp, NUM_CLASSES), np.float32)
    for i, cluster in enumerate(clusters):
        k = len(cluster) + 1            # cluster classes + dustbin class
        wkey, bkey = jax.random.split(keys[5 + i])
        spec_W[i, :, :k] = 0.02 * np.asarray(jax.random.normal(wkey, (D, k)))
        spec_b[i, :k] = 0.02 * np.asarray(jax.random.normal(bkey, (k,)))
        dustbin = len(cluster)
        spec_M[i, dustbin, :] = 1.0 / (NUM_CLASSES - dustbin)
        for c, cls in enumerate(cluster):
            spec_M[i, dustbin, cls] = 0.0
            spec_M[i, c, cls] = 1.0

    spec_W = jnp.asarray(spec_W)
    spec_b = jnp.asarray(spec_b)
    spec_M = jnp.asarray(spec_M)

    # One-time weight fold + padding (out of the per-call hot path).
    A_pad, c_pad = jax.block_until_ready(
        prepare_ensemble_params(gen_W, gen_b, spec_W, spec_b, spec_M, lc_W, lc_b))

    fwd = jax.jit(ensemble_forward)
    out = jax.block_until_ready(fwd(x, A_pad, c_pad))

    ref_matched = reference_forward_matched(
        x, gen_W, gen_b, spec_W, spec_b, spec_M, lc_W, lc_b)
    ref_f32 = reference_forward_f32(
        x, gen_W, gen_b, spec_W, spec_b, spec_M, lc_W, lc_b)

    # Tight check vs. a reference that mirrors the kernel's precision exactly.
    np.testing.assert_allclose(np.asarray(out), np.asarray(ref_matched),
                               rtol=1e-4, atol=1e-4)
    # Sanity check vs. the full-f32 unfolded module semantics (bf16-level tol).
    np.testing.assert_allclose(np.asarray(out), np.asarray(ref_f32),
                               rtol=3e-2, atol=3e-2)
    assert out.shape == (B, NUM_CLASSES)

    print("KERNEL_OK")
</pallas_src>

<mosaic_0001>
module attributes {stable_mosaic.version = 11 : i64} {
  func.func @ensemble_kernel(%arg0: i32, %arg1: memref<2x1024xbf16, #tpu.memory_space<vmem>>, %arg2: memref<1024x128xbf16, #tpu.memory_space<vmem>>, %arg3: memref<1x128xf32, #tpu.memory_space<vmem>>, %arg4: memref<2x128xf32, #tpu.memory_space<vmem>>) attributes {dimension_semantics = [#tpu.dimension_semantics<parallel>], iteration_bounds = array<i64: 1>, scalar_prefetch = 0 : i64, scratch_operands = 0 : i64, tpu.core_type = #tpu.core_type<tc>, window_params = [{transform_indices = @transform_0, window_bounds = array<i64: 2, 1024>}, {pipeline_mode = #tpu.pipeline_mode<synchronous>, transform_indices = @transform_1, window_bounds = array<i64: 1024, 128>}, {pipeline_mode = #tpu.pipeline_mode<synchronous>, transform_indices = @transform_2, window_bounds = array<i64: 1, 128>}, {transform_indices = @transform_3, window_bounds = array<i64: 2, 128>}]} {
    %c0 = arith.constant 0 : index
    %c0_0 = arith.constant 0 : index
    %0 = vector.load %arg1[%c0, %c0_0] : memref<2x1024xbf16, #tpu.memory_space<vmem>>, vector<2x1024xbf16>
    %c0_1 = arith.constant 0 : index
    %c0_2 = arith.constant 0 : index
    %1 = vector.load %arg2[%c0_1, %c0_2] : memref<1024x128xbf16, #tpu.memory_space<vmem>>, vector<1024x128xbf16>
    %cst = arith.constant dense<0.000000e+00> : vector<2x128xf32>
    %2 = tpu.matmul %0, %1, %cst {dimension_numbers = #tpu.dot_dimension_numbers<[1], [0], [0], [1], [0, 0, 1, 1], [], []>} : vector<2x1024xbf16>, vector<1024x128xbf16>, vector<2x128xf32> -> vector<2x128xf32>
    %c0_3 = arith.constant 0 : index
    %c0_4 = arith.constant 0 : index
    %3 = vector.load %arg3[%c0_3, %c0_4] : memref<1x128xf32, #tpu.memory_space<vmem>>, vector<1x128xf32>
    %4 = vector.broadcast %3 : vector<1x128xf32> to vector<2x128xf32>
    %5 = arith.addf %2, %4 : vector<2x128xf32>
    %cst_5 = arith.constant 0.000000e+00 : f32
    %6 = vector.broadcast %cst_5 : f32 to vector<2x128xf32>
    %7 = arith.maximumf %5, %6 : vector<2x128xf32>
    %c0_6 = arith.constant 0 : index
    %c0_7 = arith.constant 0 : index
    %8 = vector.load %arg4[%c0_6, %c0_7] : memref<2x128xf32, #tpu.memory_space<vmem>>, vector<2x128xf32>
    tpu.vector_store %arg4[%c0_6, %c0_7], %7 {strides = array<i32>} : memref<2x128xf32, #tpu.memory_space<vmem>>, vector<2x128xf32>,
    return
  }
  func.func @transform_0(%arg0: i32) -> (i32, i32) {
    %c0_i32 = arith.constant 0 : i32
    %c0_i32_0 = arith.constant 0 : i32
    return %arg0, %c0_i32 : i32, i32
  }
  func.func @transform_1(%arg0: i32) -> (i32, i32) {
    %c0_i32 = arith.constant 0 : i32
    %c0_i32_0 = arith.constant 0 : i32
    %c0_i32_1 = arith.constant 0 : i32
    return %c0_i32, %c0_i32_0 : i32, i32
  }
  func.func @transform_2(%arg0: i32) -> (i32, i32) {
    %c0_i32 = arith.constant 0 : i32
    %c0_i32_0 = arith.constant 0 : i32
    %c0_i32_1 = arith.constant 0 : i32
    return %c0_i32, %c0_i32_0 : i32, i32
  }
  func.func @transform_3(%arg0: i32) -> (i32, i32) {
    %c0_i32 = arith.constant 0 : i32
    %c0_i32_0 = arith.constant 0 : i32
    return %arg0, %c0_i32 : i32, i32
  }
}

</mosaic_0001>

<bundles_post_ra>
// kernel: ensemble_forward.1
= control target key start
LH: loop header
LB: loop body
LE: loop exit
PB: predicated region body
PF: predicated region fallthrough
CT: control target
= control target key end

     0   :  { %8 = vsyncpa [#allocation3], 0  ;;  %s1102_s0 = inlined_call_operand.vmem [shape: bf16[2,1024], index: 0, kind: input, shape index: {}]   ;;  %s1103_s1 = inlined_call_operand.hbm [shape: bf16[1024,128], index: 1, kind: input, shape index: {}]   ;;  %s1104_s2 = inlined_call_operand.vmem [shape: f32[1,128], index: 2, kind: input, shape index: {}]   ;;  %s1105_s3 = inlined_call_operand.hbm [shape: f32[2,128], index: 3, kind: output, shape index: {}]  }
   0x1   :  { %9 = vsyncpa [#allocation4], 0  ;;  %s1052_s12 = smov [#allocation2]  }
   0x2   :  { %s17_s13 = sshll.u32 %s1052_s12, 4  ;;  %s18_s13 = int_to_ptr.vmem [resolvable:$true] %s17_s13 }
   0x3   :  { %s1016_s14 = scalar_lea.vmem %s18_s13, 8192  ;;  %p1021_p1 = scmp.lt.s32.totalorder %s18_s13, %s18_s13 }
   0x4   :  { %p1017_p0 = scmp.ne.s32.totalorder %s18_s13, %s1016_s14  ;;  %p1022_p2 = scmp.lt.s32.totalorder %s1016_s14, %s1016_s14 }
   0x6   :  { %p1023_p3 = por %p1022_p2, %p1021_p1 }
   0x8   :  { %p1024_p4 = pnand %p1023_p3, %p1017_p0 }
   0xa   :  { %1027 = shalt.err (!%p1024_p4)
}
   0xb   :  { %s1053_s15 = smov 64   ;;  %s1054_s16 = smov 4  }
   0xc   :  { %23 = dma.hbm_to_vmem [thread:$0]  %s1103_s1, 8192, %s18_s13, [#allocation3], %s1053_s15, %s1053_s15, %s1054_s16  }
   0xd   :  { %1048 = dma.done.wait [#allocation3], 8192  }
   0xe   :  { %1049 = vsyncadd [#allocation3], 4294959104  ;;  %v943_v0 = vld [vmem:[#allocation2 + $0x78] sm:$0xff]   ;;  %v947_v4 = vld [vmem:[#allocation2 + $0x70] sm:$0xff]   ;;  %v1055_v22 = vmov 1966171168   ;;  %v171_v24 = vlaneseq }
   0xf   :  { %v944_v1 = vld [vmem:[#allocation2 + $0xf8] sm:$0xff]   ;;  %850 = vmatprep.subr.bf16.mxu0 %v943_v0  ;;  %v948_v5 = vld [vmem:[#allocation2 + $0xf0] sm:$0xff]   ;;  %v951_v8 = vld [vmem:[#allocation2 + $0x68] sm:$0xff]   ;;  %v169_v23 = vunpack.c.l.s4 %v1055_v22  ;;  %s1056_s21 = smov [#allocation5]  }
  0x10   :  { %v945_v2 = vld [vmem:[#allocation2 + $0x38] sm:$0xff]   ;;  %872 = vmatprep.subr.bf16.mxu1 %v944_v1  ;;  %v949_v6 = vld [vmem:[#allocation2 + $0x30] sm:$0xff]   ;;  %v952_v9 = vld [vmem:[#allocation2 + $0xe8] sm:$0xff]   ;;  %v172_v30 = vshrl.u32 %v171_v24, 7  ;;  %s776_s22 = sshll.u32 %s1056_s21, 4  ;;  %s777_s22 = int_to_ptr.vmem [resolvable:$true] %s776_s22 }
  0x11   :  { %v946_v3 = vld [vmem:[#allocation2 + $0xb8] sm:$0xff]   ;;  %851 = vmatpush3.bf16.msra.mxu0 %v945_v2  ;;  %v950_v7 = vld [vmem:[#allocation2 + $0xb0] sm:$0xff]   ;;  %v953_v10 = vld [vmem:[#allocation2 + $0x28] sm:$0xff]   ;;  %v170_v29 = vunpack.c.0.s8 %v169_v23  ;;  %p1033_p6 = scmp.lt.s32.totalorder %s777_s22, %s777_s22 }
  0x12   :  { %873 = vmatpush3.bf16.msra.mxu1 %v946_v3  ;;  %852 = vmatprep.subr.bf16.mxu0 %v947_v4  ;;  %v954_v11 = vld [vmem:[#allocation2 + $0xa8] sm:$0xff]   ;;  %v955_v12 = vld [vmem:[#allocation2 + $0x60] sm:$0xff]   ;;  %v959_v16 = vld [vmem:[#allocation2 + $0x58] sm:$0xff]  }
  0x13   :  { %874 = vmatprep.subr.bf16.mxu1 %v948_v5  ;;  %v956_v13 = vld [vmem:[#allocation2 + $0xe0] sm:$0xff]   ;;  %v960_v17 = vld [vmem:[#allocation2 + $0xd8] sm:$0xff]   ;;  %v963_v20 = vld [vmem:[#allocation2 + $0x50] sm:$0xff]   ;;  %v1080_v35 = vsub.s32 %v170_v29, %v172_v30 }
  0x14   :  { %v957_v14 = vld [vmem:[#allocation2 + $0x20] sm:$0xff]   ;;  %v961_v18 = vld [vmem:[#allocation2 + $0x18] sm:$0xff]   ;;  %v964_v21 = vld [vmem:[#allocation2 + $0xd0] sm:$0xff]  }
  0x15   :  { %853 = vmatpush3.bf16.msra.mxu0 %v949_v6  ;;  %v958_v15 = vld [vmem:[#allocation2 + $0xa0] sm:$0xff]   ;;  %v962_v19 = vld [vmem:[#allocation2 + $0x98] sm:$0xff]   ;;  %v965_v25 = vld [vmem:[#allocation2 + $0x10] sm:$0xff]  }
  0x16   :  { %875 = vmatpush3.bf16.msra.mxu1 %v950_v7  ;;  %854 = vmatprep.subr.bf16.mxu0 %v951_v8  ;;  %v966_v26 = vld [vmem:[#allocation2 + $0x90] sm:$0xff]   ;;  %v967_v27 = vld [vmem:[#allocation2 + $0x48] sm:$0xff]   ;;  %v971_v33 = vld [vmem:[#allocation2 + $0x40] sm:$0xff]  }
  0x17   :  { %876 = vmatprep.subr.bf16.mxu1 %v952_v9  ;;  %v968_v28 = vld [vmem:[#allocation2 + $0xc8] sm:$0xff]   ;;  %v972_v34 = vld [vmem:[#allocation2 + $0xc0] sm:$0xff]   ;;  %v976_v41 = vld [vmem:[#allocation2 + $0x178] sm:$0xff]  }
  0x18   :  { %v969_v31 = vld [vmem:[#allocation2 + $0x8] sm:$0xff]   ;;  %v973_v36 = vld [vmem:[#allocation2] sm:$0xff]   ;;  %v977_v42 = vld [vmem:[#allocation2 + $0x1f8] sm:$0xff]  }
  0x19   :  { %855 = vmatpush3.bf16.msra.mxu0 %v953_v10  ;;  %v970_v32 = vld [vmem:[#allocation2 + $0x88] sm:$0xff]   ;;  %v974_v37 = vld [vmem:[#allocation2 + $0x80] sm:$0xff]   ;;  %v978_v47 = vld [vmem:[#allocation2 + $0x138] sm:$0xff]  }
  0x1a   :  { %877 = vmatpush3.bf16.msra.mxu1 %v954_v11  ;;  %856 = vmatprep.subr.bf16.mxu0 %v955_v12  ;;  %v30_v38 = vld [vmem:[%s1102_s0] sm:$0xff]  ;;  %v980_v50 = vld [vmem:[#allocation2 + $0x170] sm:$0xff]   ;;  %v979_v52 = vld [vmem:[#allocation2 + $0x1b8] sm:$0xff]  }
  0x1b   :  { %878 = vmatprep.subr.bf16.mxu1 %v956_v13  ;;  %v167_v39 = vcombine.high %v30_v38, %v30_v38  ;;  %v174_v40 = vrot.slane %v30_v38, %v1080_v35  ;;  %v981_v54 = vld [vmem:[#allocation2 + $0x1f0] sm:$0xff]   ;;  %v984_v57 = vld [vmem:[#allocation2 + $0x168] sm:$0xff]   ;;  %v988_v61 = vld [vmem:[#allocation2 + $0x160] sm:$0xff]  }
  0x1c   :  { %v982_v55 = vld [vmem:[#allocation2 + $0x130] sm:$0xff]   ;;  %v985_v59 = vld [vmem:[#allocation2 + $0x1e8] sm:$0xff]   ;;  %v989_v63 = vld [vmem:[#allocation2 + $0x1e0] sm:$0xff]  }
  0x1d   :  { %857 = vmatpush3.bf16.msra.mxu0 %v957_v14  ;;  %v182_v43 = vcombine.high %v174_v40, %v174_v40  ;;  %v190_v44 = vrot.slane %v174_v40, %v1080_v35  ;;  %v1088_v45 = vrot.slane %v167_v39, %v1080_v35  ;;  %v983_v58 = vld [vmem:[#allocation2 + $0x1b0] sm:$0xff]   ;;  %v986_v60 = vld [vmem:[#allocation2 + $0x128] sm:$0xff]   ;;  %v990_v0 = vld [vmem:[#allocation2 + $0x120] sm:$0xff]  }
  0x1e   :  { %879 = vmatpush3.bf16.msra.mxu1 %v958_v15  ;;  %858 = vmatprep.subr.bf16.mxu0 %v959_v16  ;;  %v987_v62 = vld [vmem:[#allocation2 + $0x1a8] sm:$0xff]   ;;  %v992_v1 = vld [vmem:[#allocation2 + $0x158] sm:$0xff]   ;;  %v991_v2 = vld [vmem:[#allocation2 + $0x1a0] sm:$0xff]  }
  0x1f   :  { %880 = vmatprep.subr.bf16.mxu1 %v960_v17  ;;  %v204_v46 = vrot.slane %v182_v43, %v1080_v35  ;;  %v183_v48 = vcombine.high %v1088_v45, %v1088_v45  ;;  %v212_v49 = vcombine.high %v190_v44, %v190_v44  ;;  %v993_v3 = vld [vmem:[#allocation2 + $0x1d8] sm:$0xff]   ;;  %v996_v5 = vld [vmem:[#allocation2 + $0x150] sm:$0xff]   ;;  %v1000_v9 = vld [vmem:[#allocation2 + $0x148] sm:$0xff]   ;;  %v197_v17 = vrot.slane %v1088_v45, %v1080_v35 }
  0x20   :  { %v994_v4 = vld [vmem:[#allocation2 + $0x118] sm:$0xff]   ;;  %v997_v7 = vld [vmem:[#allocation2 + $0x1d0] sm:$0xff]   ;;  %v1001_v11 = vld [vmem:[#allocation2 + $0x1c8] sm:$0xff]  }
  0x21   :  { %859 = vmatpush3.bf16.msra.mxu0 %v961_v18  ;;  %640 = vmatprep.mubr.bf16.mxu0 %v204_v46  ;;  %v214_v51 = vcombine.high %v204_v46, %v204_v46  ;;  %v211_v53 = vrot.slane %v183_v48, %v1080_v35  ;;  %v995_v6 = vld [vmem:[#allocation2 + $0x198] sm:$0xff]   ;;  %v998_v8 = vld [vmem:[#allocation2 + $0x110] sm:$0xff]   ;;  %v1002_v12 = vld [vmem:[#allocation2 + $0x108] sm:$0xff]  }
  0x22   :  { %881 = vmatpush3.bf16.msra.mxu1 %v962_v19  ;;  %860 = vmatprep.subr.bf16.mxu0 %v963_v20  ;;  %v999_v10 = vld [vmem:[#allocation2 + $0x190] sm:$0xff]   ;;  %v1004_v13 = vld [vmem:[#allocation2 + $0x140] sm:$0xff]   ;;  %v1003_v14 = vld [vmem:[#allocation2 + $0x188] sm:$0xff]   ;;  %v213_v19 = vcombine.high %v197_v17, %v197_v17 }
  0x23   :  { %882 = vmatprep.subr.bf16.mxu1 %v964_v21  ;;  %680 = vmatprep.mubr.bf16.mxu1 %v214_v51  ;;  %v215_v56 = vcombine.high %v211_v53, %v211_v53  ;;  %v1005_v15 = vld [vmem:[#allocation2 + $0x1c0] sm:$0xff]  }
  0x24   :  { %v1006_v16 = vld [vmem:[#allocation2 + $0x100] sm:$0xff]  }
  0x25   :  { %861 = vmatpush3.bf16.msra.mxu0 %v965_v25  ;;  %v1007_v18 = vld [vmem:[#allocation2 + $0x180] sm:$0xff]  }
  0x26   :  { %883 = vmatpush3.bf16.msra.mxu1 %v966_v26  ;;  %862 = vmatprep.subr.bf16.mxu0 %v967_v27  ;;  %v785_v29 = vld [vmem:[%s1104_s2] ss:$0 sm:$0xff]  ;;  %s1028_s2 = scalar_lea.vmem %s777_s22, 32 }
  0x27   :  { %884 = vmatprep.subr.bf16.mxu1 %v968_v28  ;;  %p1029_p5 = scmp.ne.s32.totalorder %s777_s22, %s1028_s2  ;;  %p1034_p7 = scmp.lt.s32.totalorder %s1028_s2, %s1028_s2 }
  0x29   :  { %863 = vmatpush3.bf16.msra.mxu0 %v969_v31  ;;  %p1035_p8 = por %p1034_p7, %p1033_p6 }
  0x2a   :  { %885 = vmatpush3.bf16.msra.mxu1 %v970_v32  ;;  %864 = vmatprep.subr.bf16.mxu0 %v971_v33 }
  0x2b   :  { %886 = vmatprep.subr.bf16.mxu1 %v972_v34  ;;  %p1036_p9 = pnand %p1035_p8, %p1029_p5 }
  0x2d   :  { %865 = vmatpush3.bf16.msra.mxu0 %v973_v36 }
  0x2e   :  { %887 = vmatpush3.bf16.msra.mxu1 %v974_v37  ;;  %894 = vmatprep.subr.bf16.mxu0 %v976_v41 }
  0x2f   :  { %916 = vmatprep.subr.bf16.mxu1 %v977_v42 }
  0x30   :  { %641 = vmatmul.mubr.bf16.vlgmr.msra.gmra.mxu0 %v190_v44 }
  0x31   :  { %895 = vmatpush3.bf16.msra.mxu0 %v978_v47  ;;  %681 = vmatmul.mubr.bf16.vlgmr.msra.gmra.mxu1 %v212_v49 }
  0x32   :  { %896 = vmatprep.subr.bf16.mxu0 %v980_v50  ;;  %917 = vmatpush3.bf16.msra.mxu1 %v979_v52 }
  0x33   :  { %720 = vmatprep.mubr.bf16.mxu0 %v211_v53  ;;  %918 = vmatprep.subr.bf16.mxu1 %v981_v54 }
  0x34   :  { %760 = vmatprep.mubr.bf16.mxu1 %v215_v56 }
  0x35   :  { %897 = vmatpush3.bf16.msra.mxu0 %v982_v55 }
  0x36   :  { %898 = vmatprep.subr.bf16.mxu0 %v984_v57  ;;  %919 = vmatpush3.bf16.msra.mxu1 %v983_v58 }
  0x37   :  { %920 = vmatprep.subr.bf16.mxu1 %v985_v59 }
  0x39   :  { %899 = vmatpush3.bf16.msra.mxu0 %v986_v60 }
  0x3a   :  { %900 = vmatprep.subr.bf16.mxu0 %v988_v61  ;;  %921 = vmatpush3.bf16.msra.mxu1 %v987_v62 }
  0x3b   :  { %922 = vmatprep.subr.bf16.mxu1 %v989_v63 }
  0x3d   :  { %901 = vmatpush3.bf16.msra.mxu0 %v990_v0 }
  0x3e   :  { %902 = vmatprep.subr.bf16.mxu0 %v992_v1  ;;  %923 = vmatpush3.bf16.msra.mxu1 %v991_v2 }
  0x3f   :  { %924 = vmatprep.subr.bf16.mxu1 %v993_v3 }
  0x41   :  { %903 = vmatpush3.bf16.msra.mxu0 %v994_v4 }
  0x42   :  { %904 = vmatprep.subr.bf16.mxu0 %v996_v5  ;;  %925 = vmatpush3.bf16.msra.mxu1 %v995_v6 }
  0x43   :  { %926 = vmatprep.subr.bf16.mxu1 %v997_v7 }
  0x45   :  { %905 = vmatpush3.bf16.msra.mxu0 %v998_v8 }
  0x46   :  { %906 = vmatprep.subr.bf16.mxu0 %v1000_v9  ;;  %927 = vmatpush3.bf16.msra.mxu1 %v999_v10 }
  0x47   :  { %928 = vmatprep.subr.bf16.mxu1 %v1001_v11 }
  0x49   :  { %907 = vmatpush3.bf16.msra.mxu0 %v1002_v12 }
  0x4a   :  { %908 = vmatprep.subr.bf16.mxu0 %v1004_v13  ;;  %929 = vmatpush3.bf16.msra.mxu1 %v1003_v14 }
  0x4b   :  { %930 = vmatprep.subr.bf16.mxu1 %v1005_v15 }
  0x4d   :  { %909 = vmatpush3.bf16.msra.mxu0 %v1006_v16 }
  0x4e   :  { %931 = vmatpush3.bf16.msra.mxu1 %v1007_v18 }
  0x50   :  { %721 = vmatmul.mubr.bf16.vlgmr.msra.gmra.mxu0 %v197_v17 }
  0x51   :  { %761 = vmatmul.mubr.bf16.vlgmr.msra.gmra.mxu1 %v213_v19 }
  0xf0   :  { %v866_v20 = vpop.f32.mrf.mxu0 }
  0xf1   :  { %v888_v21 = vpop.f32.mrf.mxu1 }
  0xf2   :  { %v867_v22 = vpop.f32.mrf.mxu0 }
  0xf3   :  { %v889_v23 = vpop.f32.mrf.mxu1  ;;  %v868_v28 = vadd.f32 %v867_v22, %v866_v20 }
  0xf4   :  { %v869_v24 = vpop.f32.mrf.mxu0  ;;  %v890_v31 = vadd.f32 %v889_v23, %v888_v21 }
  0xf5   :  { %v891_v25 = vpop.f32.mrf.mxu1  ;;  %v643_v30 = vadd.f32 %v868_v28, %v785_v29 }
  0xf6   :  { %v870_v26 = vpop.f32.mrf.mxu0 }
  0xf7   :  { %v892_v27 = vpop.f32.mrf.mxu1  ;;  %v683_v35 = vadd.f32 %v890_v31, %v643_v30 }
 0x110   :  { %v910_v32 = vpop.f32.mrf.mxu0 }
 0x111   :  { %v932_v33 = vpop.f32.mrf.mxu1 }
 0x112   :  { %v911_v34 = vpop.f32.mrf.mxu0 }
 0x113   :  { %v912_v36 = vadd.f32 %v911_v34, %v910_v32  ;;  %v933_v37 = vpop.f32.mrf.mxu1 }
 0x114   :  { %v913_v38 = vpop.f32.mrf.mxu0  ;;  %v934_v40 = vadd.f32 %v933_v37, %v932_v33 }
 0x115   :  { %v723_v39 = vadd.f32 %v912_v36, %v683_v35  ;;  %v935_v41 = vpop.f32.mrf.mxu1 }
 0x116   :  { %v914_v42 = vpop.f32.mrf.mxu0 }
 0x117   :  { %v763_v43 = vadd.f32 %v934_v40, %v723_v39  ;;  %v936_v44 = vpop.f32.mrf.mxu1 }
 0x119   :  { %v768_v45 = vmax.f32 %v763_v43, 0.0 }
 0x11b   :  { %769 = vst [vmem:[#allocation5] sm:$0x3] %v768_v45 }
 0x11c   :  { %1039 = shalt.err (!%p1036_p9)
}
 0x11d   :  { %779 = dma.vmem_to_hbm [thread:$0]  %s777_s22, 32, %s1105_s3, [#allocation4]  }
 0x11e   :  { %1050 = dma.done.wait [#allocation4], 32  }
 0x11f   :  { %1051 = vsyncadd [#allocation4], 4294967264 }
 0x120   :  { %783 = vsyncpa [#allocation3], 1 }
 0x121   :  { %784 = vsyncpa [#allocation4], 1 }

</bundles_post_ra>
